<compile_context>
chip_gen: v5e
topology: v5e:2x2
jax: 0.10.0
libtpu: 0.0.40
codegen_flags: <defaults>
</compile_context>

<pallas_src>
import functools

import jax
import jax.numpy as jnp
from jax.experimental import pallas as pl
from jax.experimental.pallas import tpu as pltpu

IN_DIM = 28 * 28          # 784
HIDDEN = 64
OUT_DIM = 10
OUT_PAD = 128             # lane-dense padded output width
NEG_BIG = -1e30           # bias for padded logit lanes (never wins max, exp -> 0)


def mlp_kernel(x_ref,
               w1_ref, b1_ref,
               w2_ref, b2_ref,
               w3_ref, b3_ref,
               w4_ref, b4_ref,
               o_ref):
    """One (TB, 784) f32 batch tile through the whole MLP.

    Weights/biases are VMEM-resident (constant index_maps); only the x tile and
    the output tile stream through HBM.
    """
    # f32 arrives from HBM once; cast to bf16 on-chip (hidden under the DMA).
    x = x_ref[...].astype(jnp.bfloat16)                  # (TB, 784) bf16

    # fc1 + ReLU  (bf16 MXU inputs, f32 accumulate, f32 elementwise)
    h = jnp.dot(x, w1_ref[...], preferred_element_type=jnp.float32) + b1_ref[...]
    h = jnp.maximum(h, 0.0)

    # fc2 + ReLU
    h = jnp.dot(h.astype(jnp.bfloat16), w2_ref[...],
                preferred_element_type=jnp.float32) + b2_ref[...]
    h = jnp.maximum(h, 0.0)

    # fc3 + ReLU
    h = jnp.dot(h.astype(jnp.bfloat16), w3_ref[...],
                preferred_element_type=jnp.float32) + b3_ref[...]
    h = jnp.maximum(h, 0.0)

    # fc4 (lane-padded to 128 cols; padded cols get bias = -1e30)
    logits = jnp.dot(h.astype(jnp.bfloat16), w4_ref[...],
                     preferred_element_type=jnp.float32) + b4_ref[...]

    # log_softmax over the padded row: padded lanes contribute exp(-huge) = 0,
    # so the result on the first 10 lanes matches log_softmax over 10 classes.
    m = jnp.max(logits, axis=-1, keepdims=True)
    shifted = logits - m
    lse = jnp.log(jnp.sum(jnp.exp(shifted), axis=-1, keepdims=True))
    o_ref[...] = (shifted - lse).astype(o_ref.dtype)     # bf16, unmasked vst


def _round_up(n, m):
    return ((n + m - 1) // m) * m


def _cdiv(a, b):
    return -(-a // b)


def prepare_params(params):
    """One-time parameter prep (hoisted out of the per-call forward).

    bf16 weights for the MXU, f32 biases, fc4 padded to 128 output lanes
    (zero weight cols, -1e30 bias on pad lanes).
    """
    return {
        "w1": params["w1"].astype(jnp.bfloat16),
        "w2": params["w2"].astype(jnp.bfloat16),
        "w3": params["w3"].astype(jnp.bfloat16),
        "w4": jnp.pad(params["w4"],
                      ((0, 0), (0, OUT_PAD - OUT_DIM))).astype(jnp.bfloat16),
        "b1": params["b1"].astype(jnp.float32),
        "b2": params["b2"].astype(jnp.float32),
        "b3": params["b3"].astype(jnp.float32),
        "b4": jnp.pad(params["b4"].astype(jnp.float32),
                      ((0, 0), (0, OUT_PAD - OUT_DIM)),
                      constant_values=NEG_BIG),
    }


def _forward_padded(x, prepped, tile_batch):
    """Returns (B_pad, 128) bf16 log-probs (padded lanes/rows are garbage)."""
    B = x.shape[0]
    B8 = _round_up(B, 8)

    # Batch tile: multiple of 8 sublanes.  When B spans multiple tiles, force an
    # even, balanced tile count so v7x's two TensorCores both get work.
    if B8 <= tile_batch:
        TB = B8
    else:
        n_tiles = _cdiv(B8, tile_batch)
        if n_tiles % 2:
            n_tiles += 1
        TB = _round_up(_cdiv(B8, n_tiles), 8)

    B_pad = _round_up(B8, TB)
    n_tiles = B_pad // TB

    # Pad rows only if needed (no dtype cast here — the kernel casts on-chip).
    if B_pad != B:
        x = jnp.pad(x, ((0, B_pad - B), (0, 0)))

    resident = lambda shape: pl.BlockSpec(shape, lambda i: (0, 0))

    return pl.pallas_call(
        mlp_kernel,
        out_shape=jax.ShapeDtypeStruct((B_pad, OUT_PAD), jnp.bfloat16),
        grid=(n_tiles,),
        in_specs=[
            pl.BlockSpec((TB, IN_DIM), lambda i: (i, 0)),   # x: batch-tiled f32
            resident(prepped["w1"].shape), resident(prepped["b1"].shape),
            resident(prepped["w2"].shape), resident(prepped["b2"].shape),
            resident(prepped["w3"].shape), resident(prepped["b3"].shape),
            resident(prepped["w4"].shape), resident(prepped["b4"].shape),
        ],
        out_specs=pl.BlockSpec((TB, OUT_PAD), lambda i: (i, 0)),
        compiler_params=pltpu.CompilerParams(
            dimension_semantics=("parallel",),   # v7x: shard batch tiles over 2 TCs
            vmem_limit_bytes=32 << 20,           # ~16 MiB footprint at TB=2048
        ),
    )(x, prepped["w1"], prepped["b1"], prepped["w2"], prepped["b2"],
      prepped["w3"], prepped["b3"], prepped["w4"], prepped["b4"])


@functools.partial(jax.jit, static_argnames=("tile_batch",))
def net_forward_padded(x, prepped, *, tile_batch=2048):
    """Max-throughput entry point: padded (B_pad, 128) bf16 log-probs.

    Consumers (e.g. an NLL-loss gather) can slice lanes [:10] lazily and avoid
    an extra HBM round trip.
    """
    return _forward_padded(x, prepped, tile_batch)


@functools.partial(jax.jit, static_argnames=("tile_batch",))
def net_forward(x, prepped, *, tile_batch=2048):
    """Torch-compatible API: (B, 10) float32 log-probs."""
    B = x.shape[0]
    out = _forward_padded(x, prepped, tile_batch)
    return out[:B, :OUT_DIM].astype(jnp.float32)


def init_params(key):
    """torch.nn.Linear-style init (uniform +/- 1/sqrt(fan_in)).

    Weights stored transposed: (in_features, out_features). Biases (1, out).
    """
    dims = [(IN_DIM, HIDDEN), (HIDDEN, HIDDEN), (HIDDEN, HIDDEN), (HIDDEN, OUT_DIM)]
    params = {}
    keys = jax.random.split(key, 2 * len(dims))
    for i, (fan_in, fan_out) in enumerate(dims):
        bound = 1.0 / (fan_in ** 0.5)
        params[f"w{i + 1}"] = jax.random.uniform(
            keys[2 * i], (fan_in, fan_out),
            minval=-bound, maxval=bound, dtype=jnp.float32)
        params[f"b{i + 1}"] = jax.random.uniform(
            keys[2 * i + 1], (1, fan_out),
            minval=-bound, maxval=bound, dtype=jnp.float32)
    return params


def net_forward_ref(x, params):
    """Pure-JAX reference mirroring the kernel's bf16-matmul / f32-accum math."""
    bf = jnp.bfloat16
    h = x.astype(bf)
    h = jnp.maximum(
        jnp.dot(h, params["w1"].astype(bf), preferred_element_type=jnp.float32)
        + params["b1"], 0.0)
    h = jnp.maximum(
        jnp.dot(h.astype(bf), params["w2"].astype(bf),
                preferred_element_type=jnp.float32) + params["b2"], 0.0)
    h = jnp.maximum(
        jnp.dot(h.astype(bf), params["w3"].astype(bf),
                preferred_element_type=jnp.float32) + params["b3"], 0.0)
    logits = (jnp.dot(h.astype(bf), params["w4"].astype(bf),
                      preferred_element_type=jnp.float32) + params["b4"])
    return jax.nn.log_softmax(logits, axis=1)


if __name__ == "__main__":
    key = jax.random.PRNGKey(0)
    pkey, xkey = jax.random.split(key)

    params = init_params(pkey)
    prepped = prepare_params(params)            # one-time prep (bf16 cast, fc4 pad)

    B = 8  # small demo batch; tiling/megacore split kicks in automatically for large B
    x = jax.random.normal(xkey, (B, IN_DIM), dtype=jnp.float32)

    out = net_forward(x, prepped)
    out = jax.block_until_ready(out)

    ref = net_forward_ref(x, params)
    assert out.shape == (B, OUT_DIM)
    assert bool(jnp.all(jnp.isfinite(out)))
    # bf16 MXU inputs + bf16 output writeback: intentional inference precision trade.
    assert jnp.allclose(out, ref, atol=2e-2, rtol=2e-2)
    print("KERNEL_OK")
</pallas_src>

<mosaic_0001>
module attributes {stable_mosaic.version = 11 : i64} {
  func.func @mlp_kernel(%arg0: i32, %arg1: memref<8x784xf32, #tpu.memory_space<vmem>>, %arg2: memref<784x64xbf16, #tpu.memory_space<vmem>>, %arg3: memref<1x64xf32, #tpu.memory_space<vmem>>, %arg4: memref<64x64xbf16, #tpu.memory_space<vmem>>, %arg5: memref<1x64xf32, #tpu.memory_space<vmem>>, %arg6: memref<64x64xbf16, #tpu.memory_space<vmem>>, %arg7: memref<1x64xf32, #tpu.memory_space<vmem>>, %arg8: memref<64x128xbf16, #tpu.memory_space<vmem>>, %arg9: memref<1x128xf32, #tpu.memory_space<vmem>>, %arg10: memref<8x128xbf16, #tpu.memory_space<vmem>>) attributes {dimension_semantics = [#tpu.dimension_semantics<parallel>], iteration_bounds = array<i64: 1>, scalar_prefetch = 0 : i64, scratch_operands = 0 : i64, tpu.core_type = #tpu.core_type<tc>, window_params = [{transform_indices = @transform_0, window_bounds = array<i64: 8, 784>}, {pipeline_mode = #tpu.pipeline_mode<synchronous>, transform_indices = @transform_1, window_bounds = array<i64: 784, 64>}, {pipeline_mode = #tpu.pipeline_mode<synchronous>, transform_indices = @transform_2, window_bounds = array<i64: 1, 64>}, {pipeline_mode = #tpu.pipeline_mode<synchronous>, transform_indices = @transform_3, window_bounds = array<i64: 64, 64>}, {pipeline_mode = #tpu.pipeline_mode<synchronous>, transform_indices = @transform_4, window_bounds = array<i64: 1, 64>}, {pipeline_mode = #tpu.pipeline_mode<synchronous>, transform_indices = @transform_5, window_bounds = array<i64: 64, 64>}, {pipeline_mode = #tpu.pipeline_mode<synchronous>, transform_indices = @transform_6, window_bounds = array<i64: 1, 64>}, {pipeline_mode = #tpu.pipeline_mode<synchronous>, transform_indices = @transform_7, window_bounds = array<i64: 64, 128>}, {pipeline_mode = #tpu.pipeline_mode<synchronous>, transform_indices = @transform_8, window_bounds = array<i64: 1, 128>}, {transform_indices = @transform_9, window_bounds = array<i64: 8, 128>}]} {
    %c0 = arith.constant 0 : index
    %c0_0 = arith.constant 0 : index
    %0 = vector.load %arg1[%c0, %c0_0] : memref<8x784xf32, #tpu.memory_space<vmem>>, vector<8x784xf32>
    %1 = arith.truncf %0 : vector<8x784xf32> to vector<8x784xbf16>
    %c0_1 = arith.constant 0 : index
    %c0_2 = arith.constant 0 : index
    %2 = vector.load %arg2[%c0_1, %c0_2] : memref<784x64xbf16, #tpu.memory_space<vmem>>, vector<784x64xbf16>
    %cst = arith.constant dense<0.000000e+00> : vector<8x64xf32>
    %3 = tpu.matmul %1, %2, %cst {dimension_numbers = #tpu.dot_dimension_numbers<[1], [0], [0], [1], [0, 0, 1, 1], [], []>} : vector<8x784xbf16>, vector<784x64xbf16>, vector<8x64xf32> -> vector<8x64xf32>
    %c0_3 = arith.constant 0 : index
    %c0_4 = arith.constant 0 : index
    %4 = vector.load %arg3[%c0_3, %c0_4] : memref<1x64xf32, #tpu.memory_space<vmem>>, vector<1x64xf32>
    %5 = vector.broadcast %4 : vector<1x64xf32> to vector<8x64xf32>
    %6 = arith.addf %3, %5 : vector<8x64xf32>
    %cst_5 = arith.constant 0.000000e+00 : f32
    %7 = vector.broadcast %cst_5 : f32 to vector<8x64xf32>
    %8 = arith.maximumf %6, %7 : vector<8x64xf32>
    %9 = arith.truncf %8 : vector<8x64xf32> to vector<8x64xbf16>
    %c0_6 = arith.constant 0 : index
    %c0_7 = arith.constant 0 : index
    %10 = vector.load %arg4[%c0_6, %c0_7] : memref<64x64xbf16, #tpu.memory_space<vmem>>, vector<64x64xbf16>
    %cst_8 = arith.constant dense<0.000000e+00> : vector<8x64xf32>
    %11 = tpu.matmul %9, %10, %cst_8 {dimension_numbers = #tpu.dot_dimension_numbers<[1], [0], [0], [1], [0, 0, 1, 1], [], []>} : vector<8x64xbf16>, vector<64x64xbf16>, vector<8x64xf32> -> vector<8x64xf32>
    %c0_9 = arith.constant 0 : index
    %c0_10 = arith.constant 0 : index
    %12 = vector.load %arg5[%c0_9, %c0_10] : memref<1x64xf32, #tpu.memory_space<vmem>>, vector<1x64xf32>
    %13 = vector.broadcast %12 : vector<1x64xf32> to vector<8x64xf32>
    %14 = arith.addf %11, %13 : vector<8x64xf32>
    %cst_11 = arith.constant 0.000000e+00 : f32
    %15 = vector.broadcast %cst_11 : f32 to vector<8x64xf32>
    %16 = arith.maximumf %14, %15 : vector<8x64xf32>
    %17 = arith.truncf %16 : vector<8x64xf32> to vector<8x64xbf16>
    %c0_12 = arith.constant 0 : index
    %c0_13 = arith.constant 0 : index
    %18 = vector.load %arg6[%c0_12, %c0_13] : memref<64x64xbf16, #tpu.memory_space<vmem>>, vector<64x64xbf16>
    %cst_14 = arith.constant dense<0.000000e+00> : vector<8x64xf32>
    %19 = tpu.matmul %17, %18, %cst_14 {dimension_numbers = #tpu.dot_dimension_numbers<[1], [0], [0], [1], [0, 0, 1, 1], [], []>} : vector<8x64xbf16>, vector<64x64xbf16>, vector<8x64xf32> -> vector<8x64xf32>
    %c0_15 = arith.constant 0 : index
    %c0_16 = arith.constant 0 : index
    %20 = vector.load %arg7[%c0_15, %c0_16] : memref<1x64xf32, #tpu.memory_space<vmem>>, vector<1x64xf32>
    %21 = vector.broadcast %20 : vector<1x64xf32> to vector<8x64xf32>
    %22 = arith.addf %19, %21 : vector<8x64xf32>
    %cst_17 = arith.constant 0.000000e+00 : f32
    %23 = vector.broadcast %cst_17 : f32 to vector<8x64xf32>
    %24 = arith.maximumf %22, %23 : vector<8x64xf32>
    %25 = arith.truncf %24 : vector<8x64xf32> to vector<8x64xbf16>
    %c0_18 = arith.constant 0 : index
    %c0_19 = arith.constant 0 : index
    %26 = vector.load %arg8[%c0_18, %c0_19] : memref<64x128xbf16, #tpu.memory_space<vmem>>, vector<64x128xbf16>
    %cst_20 = arith.constant dense<0.000000e+00> : vector<8x128xf32>
    %27 = tpu.matmul %25, %26, %cst_20 {dimension_numbers = #tpu.dot_dimension_numbers<[1], [0], [0], [1], [0, 0, 1, 1], [], []>} : vector<8x64xbf16>, vector<64x128xbf16>, vector<8x128xf32> -> vector<8x128xf32>
    %c0_21 = arith.constant 0 : index
    %c0_22 = arith.constant 0 : index
    %28 = vector.load %arg9[%c0_21, %c0_22] : memref<1x128xf32, #tpu.memory_space<vmem>>, vector<1x128xf32>
    %29 = vector.broadcast %28 : vector<1x128xf32> to vector<8x128xf32>
    %30 = arith.addf %27, %29 : vector<8x128xf32>
    %cst_23 = arith.constant dense<0xFF800000> : vector<8xf32>
    %31 = vector.multi_reduction <maximumf>, %30, %cst_23 [1] : vector<8x128xf32> to vector<8xf32>
    %32 = vector.shape_cast %31 : vector<8xf32> to vector<8x1xf32>
    %33 = vector.broadcast %32 : vector<8x1xf32> to vector<8x128xf32>
    %34 = arith.subf %30, %33 : vector<8x128xf32>
    %35 = math.exp %34 : vector<8x128xf32>
    %cst_24 = arith.constant dense<0.000000e+00> : vector<8xf32>
    %36 = vector.multi_reduction <add>, %35, %cst_24 [1] : vector<8x128xf32> to vector<8xf32>
    %37 = vector.shape_cast %36 : vector<8xf32> to vector<8x1xf32>
    %38 = math.log %37 : vector<8x1xf32>
    %39 = vector.broadcast %38 : vector<8x1xf32> to vector<8x128xf32>
    %40 = arith.subf %34, %39 : vector<8x128xf32>
    %41 = arith.truncf %40 : vector<8x128xf32> to vector<8x128xbf16>
    %c0_25 = arith.constant 0 : index
    %c0_26 = arith.constant 0 : index
    %42 = vector.load %arg10[%c0_25, %c0_26] : memref<8x128xbf16, #tpu.memory_space<vmem>>, vector<8x128xbf16>
    tpu.vector_store %arg10[%c0_25, %c0_26], %41 {strides = array<i32>} : memref<8x128xbf16, #tpu.memory_space<vmem>>, vector<8x128xbf16>,
    return
  }
  func.func @transform_0(%arg0: i32) -> (i32, i32) {
    %c0_i32 = arith.constant 0 : i32
    %c0_i32_0 = arith.constant 0 : i32
    return %arg0, %c0_i32 : i32, i32
  }
  func.func @transform_1(%arg0: i32) -> (i32, i32) {
    %c0_i32 = arith.constant 0 : i32
    %c0_i32_0 = arith.constant 0 : i32
    %c0_i32_1 = arith.constant 0 : i32
    return %c0_i32, %c0_i32_0 : i32, i32
  }
  func.func @transform_2(%arg0: i32) -> (i32, i32) {
    %c0_i32 = arith.constant 0 : i32
    %c0_i32_0 = arith.constant 0 : i32
    %c0_i32_1 = arith.constant 0 : i32
    return %c0_i32, %c0_i32_0 : i32, i32
  }
  func.func @transform_3(%arg0: i32) -> (i32, i32) {
    %c0_i32 = arith.constant 0 : i32
    %c0_i32_0 = arith.constant 0 : i32
    %c0_i32_1 = arith.constant 0 : i32
    return %c0_i32, %c0_i32_0 : i32, i32
  }
  func.func @transform_4(%arg0: i32) -> (i32, i32) {
    %c0_i32 = arith.constant 0 : i32
    %c0_i32_0 = arith.constant 0 : i32
    %c0_i32_1 = arith.constant 0 : i32
    return %c0_i32, %c0_i32_0 : i32, i32
  }
  func.func @transform_5(%arg0: i32) -> (i32, i32) {
    %c0_i32 = arith.constant 0 : i32
    %c0_i32_0 = arith.constant 0 : i32
    %c0_i32_1 = arith.constant 0 : i32
    return %c0_i32, %c0_i32_0 : i32, i32
  }
  func.func @transform_6(%arg0: i32) -> (i32, i32) {
    %c0_i32 = arith.constant 0 : i32
    %c0_i32_0 = arith.constant 0 : i32
    %c0_i32_1 = arith.constant 0 : i32
    return %c0_i32, %c0_i32_0 : i32, i32
  }
  func.func @transform_7(%arg0: i32) -> (i32, i32) {
    %c0_i32 = arith.constant 0 : i32
    %c0_i32_0 = arith.constant 0 : i32
    %c0_i32_1 = arith.constant 0 : i32
    return %c0_i32, %c0_i32_0 : i32, i32
  }
  func.func @transform_8(%arg0: i32) -> (i32, i32) {
    %c0_i32 = arith.constant 0 : i32
    %c0_i32_0 = arith.constant 0 : i32
    %c0_i32_1 = arith.constant 0 : i32
    return %c0_i32, %c0_i32_0 : i32, i32
  }
  func.func @transform_9(%arg0: i32) -> (i32, i32) {
    %c0_i32 = arith.constant 0 : i32
    %c0_i32_0 = arith.constant 0 : i32
    return %arg0, %c0_i32 : i32, i32
  }
}

</mosaic_0001>

<bundles_post_ra>
// kernel: net_forward.1
= control target key start
LH: loop header
LB: loop body
LE: loop exit
PB: predicated region body
PF: predicated region fallthrough
CT: control target
= control target key end

     0   :  { %vm443_vm0 = vcmask 130048   ;;  %vm576_vm1 = vcmask 523264   ;;  %s1306_s1 = inlined_call_operand.vmem [shape: bf16[784,64], index: 1, kind: input, shape index: {}]   ;;  %s1307_s2 = inlined_call_operand.vmem [shape: f32[1,64], index: 2, kind: input, shape index: {}]   ;;  %s1308_s0 = inlined_call_operand.vmem [shape: f32[8,784], index: 0, kind: input, shape index: {}]   ;;  %s1309_s4 = inlined_call_operand.vmem [shape: f32[1,64], index: 4, kind: input, shape index: {}]   ;;  %s1310_s3 = inlined_call_operand.vmem [shape: bf16[64,64], index: 3, kind: input, shape index: {}]   ;;  %s1311_s5 = inlined_call_operand.vmem [shape: bf16[64,64], index: 5, kind: input, shape index: {}]   ;;  %s1312_s6 = inlined_call_operand.vmem [shape: f32[1,64], index: 6, kind: input, shape index: {}]   ;;  %s1313_s7 = inlined_call_operand.vmem [shape: bf16[64,128], index: 7, kind: input, shape index: {}]   ;;  %s1314_s8 = inlined_call_operand.vmem [shape: f32[1,128], index: 8, kind: input, shape index: {}]   ;;  %s1315_s9 = inlined_call_operand.vmem [shape: bf16[8,128], index: 9, kind: output, shape index: {}]  }
   0x1   :  { %v972_v0 = vld [vmem:[%s1306_s1 + $0x38] sm:$0xff]  ;;  %v971_v3 = vld [vmem:[%s1306_s1 + $0x30] sm:$0xff]  ;;  %v970_v8 = vld [vmem:[%s1306_s1 + $0x28] sm:$0xff] }
   0x2   :  { %v980_v1 = vld [vmem:[%s1306_s1 + $0x78] sm:$0xff]  ;;  %447 = vmatpush.bf16.msra.mxu0 %v972_v0  ;;  %v979_v4 = vld [vmem:[%s1306_s1 + $0x70] sm:$0xff]  ;;  %v978_v9 = vld [vmem:[%s1306_s1 + $0x68] sm:$0xff] }
   0x3   :  { %v988_v2 = vld [vmem:[%s1306_s1 + $0xb8] sm:$0xff]  ;;  %460 = vmatpush.bf16.msra.mxu1 %v980_v1  ;;  %v987_v5 = vld [vmem:[%s1306_s1 + $0xb0] sm:$0xff]  ;;  %v986_v10 = vld [vmem:[%s1306_s1 + $0xa8] sm:$0xff] }
   0x4   :  { %473 = vmatpush.bf16.msra.mxu2 %v988_v2  ;;  %v996_v6 = vld [vmem:[%s1306_s1 + $0xf8] sm:$0xff]  ;;  %v995_v7 = vld [vmem:[%s1306_s1 + $0xf0] sm:$0xff]  ;;  %v994_v11 = vld [vmem:[%s1306_s1 + $0xe8] sm:$0xff] }
   0x5   :  { %486 = vmatpush.bf16.msra.mxu3 %v996_v6  ;;  %v969_v12 = vld [vmem:[%s1306_s1 + $0x20] sm:$0xff]  ;;  %v968_v16 = vld [vmem:[%s1306_s1 + $0x18] sm:$0xff]  ;;  %v967_v20 = vld [vmem:[%s1306_s1 + $0x10] sm:$0xff] }
   0x6   :  { %448 = vmatpush.bf16.msra.mxu0 %v971_v3  ;;  %v977_v13 = vld [vmem:[%s1306_s1 + $0x60] sm:$0xff]  ;;  %v976_v17 = vld [vmem:[%s1306_s1 + $0x58] sm:$0xff]  ;;  %v975_v21 = vld [vmem:[%s1306_s1 + $0x50] sm:$0xff] }
   0x7   :  { %461 = vmatpush.bf16.msra.mxu1 %v979_v4  ;;  %v985_v14 = vld [vmem:[%s1306_s1 + $0xa0] sm:$0xff]  ;;  %v984_v18 = vld [vmem:[%s1306_s1 + $0x98] sm:$0xff]  ;;  %v983_v22 = vld [vmem:[%s1306_s1 + $0x90] sm:$0xff] }
   0x8   :  { %474 = vmatpush.bf16.msra.mxu2 %v987_v5  ;;  %v993_v15 = vld [vmem:[%s1306_s1 + $0xe0] sm:$0xff]  ;;  %v992_v19 = vld [vmem:[%s1306_s1 + $0xd8] sm:$0xff]  ;;  %v991_v23 = vld [vmem:[%s1306_s1 + $0xd0] sm:$0xff] }
   0x9   :  { %487 = vmatpush.bf16.msra.mxu3 %v995_v7  ;;  %v966_v24 = vld [vmem:[%s1306_s1 + $0x8] sm:$0xff]  ;;  %v965_v27 = vld [vmem:[%s1306_s1] sm:$0xff]  ;;  %v1004_v32 = vld [vmem:[%s1306_s1 + $0x138] sm:$0xff] }
   0xa   :  { %449 = vmatpush.bf16.msra.mxu0 %v970_v8  ;;  %v974_v25 = vld [vmem:[%s1306_s1 + $0x48] sm:$0xff]  ;;  %v973_v29 = vld [vmem:[%s1306_s1 + $0x40] sm:$0xff]  ;;  %v1012_v33 = vld [vmem:[%s1306_s1 + $0x178] sm:$0xff] }
   0xb   :  { %462 = vmatpush.bf16.msra.mxu1 %v978_v9  ;;  %v982_v26 = vld [vmem:[%s1306_s1 + $0x88] sm:$0xff]  ;;  %v33_v30 = vld [vmem:[%s1308_s0] sm:$0xff]  ;;  %v35_v35 = vld [vmem:[%s1308_s0 + $0x10] sm:$0xff] }
   0xc   :  { %475 = vmatpush.bf16.msra.mxu2 %v986_v10  ;;  %v990_v28 = vld [vmem:[%s1306_s1 + $0xc8] sm:$0xff]  ;;  %v981_v34 = vld [vmem:[%s1306_s1 + $0x80] sm:$0xff]  ;;  %v40_v36 = vpack.c.bf16 %v33_v30, %v33_v30  ;;  %v36_v40 = vld [vmem:[%s1308_s0 + $0x18] sm:$0xff]  ;;  %v42_v43 = vpack.c.bf16 %v35_v35, %v35_v35 }
   0xd   :  { %488 = vmatpush.bf16.msra.mxu3 %v994_v11  ;;  %v34_v31 = vld [vmem:[%s1308_s0 + $0x8] sm:$0xff]  ;;  %v989_v38 = vld [vmem:[%s1306_s1 + $0xc0] sm:$0xff]  ;;  %v1003_v41 = vld [vmem:[%s1306_s1 + $0x130] sm:$0xff]  ;;  %v43_v44 = vpack.c.bf16 %v36_v40, %v36_v40 }
   0xe   :  { %450 = vmatpush.bf16.msra.mxu0 %v969_v12  ;;  %v41_v37 = vpack.c.bf16 %v34_v31, %v34_v31  ;;  %v1013_v39 = vld [vmem:[%s1306_s1 + $0x180] sm:$0xff]  ;;  %v1011_v42 = vld [vmem:[%s1306_s1 + $0x170] sm:$0xff]  ;;  %v1002_v45 = vld [vmem:[%s1306_s1 + $0x128] sm:$0xff] }
   0xf   :  { %463 = vmatpush.bf16.msra.mxu1 %v977_v13  ;;  %v1010_v46 = vld [vmem:[%s1306_s1 + $0x168] sm:$0xff]  ;;  %v1001_v47 = vld [vmem:[%s1306_s1 + $0x120] sm:$0xff]  ;;  %v1000_v49 = vld [vmem:[%s1306_s1 + $0x118] sm:$0xff] }
  0x10   :  { %476 = vmatpush.bf16.msra.mxu2 %v985_v14  ;;  %v1009_v48 = vld [vmem:[%s1306_s1 + $0x160] sm:$0xff]  ;;  %v1008_v50 = vld [vmem:[%s1306_s1 + $0x158] sm:$0xff]  ;;  %v39_v51 = vld [vmem:[%s1308_s0 + $0x30] sm:$0xff] }
  0x11   :  { %489 = vmatpush.bf16.msra.mxu3 %v993_v15  ;;  %v999_v52 = vld [vmem:[%s1306_s1 + $0x110] sm:$0xff]  ;;  %v46_v54 = vpack.c.bf16 %v39_v51, %v39_v51  ;;  %v998_v55 = vld [vmem:[%s1306_s1 + $0x108] sm:$0xff]  ;;  %v997_v57 = vld [vmem:[%s1306_s1 + $0x100] sm:$0xff] }
  0x12   :  { %451 = vmatpush.bf16.msra.mxu0 %v968_v16  ;;  %v1007_v53 = vld [vmem:[%s1306_s1 + $0x150] sm:$0xff]  ;;  %v1006_v56 = vld [vmem:[%s1306_s1 + $0x148] sm:$0xff]  ;;  %v1005_v58 = vld [vmem:[%s1306_s1 + $0x140] sm:$0xff] }
  0x13   :  { %464 = vmatpush.bf16.msra.mxu1 %v976_v17  ;;  %v37_v59 = vld [vmem:[%s1308_s0 + $0x20] sm:$0xff]  ;;  %v38_v60 = vld [vmem:[%s1308_s0 + $0x28] sm:$0xff]  ;;  %v1017_v63 = vld [vmem:[%s1310_s3 + $0x18] sm:$0xff] }
  0x14   :  { %477 = vmatpush.bf16.msra.mxu2 %v984_v18  ;;  %v44_v61 = vpack.c.bf16 %v37_v59, %v37_v59  ;;  %v45_v62 = vpack.c.bf16 %v38_v60, %v38_v60  ;;  %v1016_v0 = vld [vmem:[%s1310_s3 + $0x10] sm:$0xff]  ;;  %v1015_v1 = vld [vmem:[%s1310_s3 + $0x8] sm:$0xff]  ;;  %v1014_v4 = vld [vmem:[%s1310_s3] sm:$0xff] }
  0x15   :  { %490 = vmatpush.bf16.msra.mxu3 %v992_v19  ;;  %v1021_v7 = vld [vmem:[%s1311_s5 + $0x18] sm:$0xff]  ;;  %v1020_v10 = vld [vmem:[%s1311_s5 + $0x10] sm:$0xff]  ;;  %v1026_v11 = vld [vmem:[%s1307_s2] ss:$0 sm:$0xff] }
  0x16   :  { %452 = vmatpush.bf16.msra.mxu0 %v967_v20  ;;  %v1019_v12 = vld [vmem:[%s1311_s5 + $0x8] sm:$0xff]  ;;  %v1018_v30 = vld [vmem:[%s1311_s5] sm:$0xff]  ;;  %v1025_v31 = vld [vmem:[%s1313_s7 + $0x18] sm:$0xff] }
  0x17   :  { %465 = vmatpush.bf16.msra.mxu1 %v975_v21  ;;  %v1022_v40 = vld [vmem:[%s1313_s7] sm:$0xff] }
  0x18   :  { %478 = vmatpush.bf16.msra.mxu2 %v983_v22 }
  0x19   :  { %491 = vmatpush.bf16.msra.mxu3 %v991_v23 }
  0x1a   :  { %453 = vmatpush.bf16.msra.mxu0 %v966_v24 }
  0x1b   :  { %466 = vmatpush.bf16.msra.mxu1 %v974_v25 }
  0x1c   :  { %479 = vmatpush.bf16.msra.mxu2 %v982_v26 }
  0x1d   :  { %492 = vmatpush.bf16.msra.mxu3 %v990_v28 }
  0x1e   :  { %454 = vmatpush.bf16.msra.mxu0 %v965_v27 }
  0x1f   :  { %467 = vmatpush.bf16.msra.mxu1 %v973_v29 }
  0x20   :  { %480 = vmatpush.bf16.msra.mxu2 %v981_v34  ;;  %v1027_v34 = vld [vmem:[%s1309_s4] ss:$0 sm:$0xff] }
  0x21   :  { %455 = vmatmul.bf16.vlgmr.msra.gmra.mxu0 %v40_v36  ;;  %493 = vmatpush.bf16.msra.mxu3 %v989_v38 }
  0x22   :  { %499 = vmatpush.bf16.msrb.mxu0 %v1004_v32  ;;  %468 = vmatmul.bf16.vlgmr.msra.gmra.mxu1 %v41_v37  ;;  %v1024_v32 = vld [vmem:[%s1313_s7 + $0x10] sm:$0xff] }
  0x23   :  { %512 = vmatpush.bf16.msrb.mxu1 %v1012_v33  ;;  %481 = vmatmul.bf16.vlgmr.msra.gmra.mxu2 %v42_v43  ;;  %v1023_v33 = vld [vmem:[%s1313_s7 + $0x8] sm:$0xff] }
  0x24   :  { %532 = vmatpush.bf16.msrb.mxu2 %v1013_v39  ;;  %494 = vmatmul.bf16.vlgmr.msra.gmra.mxu3 %v43_v44 }
  0x25   :  { %584 = vmatpush.bf16.msrb.mxu3 %v1017_v63 }
  0x26   :  { %500 = vmatpush.bf16.msrb.mxu0 %v1003_v41  ;;  %v1028_v41 = vld [vmem:[%s1312_s6] ss:$0 sm:$0xff] }
  0x27   :  { %513 = vmatpush.bf16.msrb.mxu1 %v1011_v42 }
  0x28   :  { %638 = vmatpush.bf16.msra.mxu2 %v1021_v7 }
  0x29   :  { %585 = vmatpush.bf16.msrb.mxu3 %v1016_v0 }
  0x2a   :  { %501 = vmatpush.bf16.msrb.mxu0 %v1002_v45 }
  0x2b   :  { %514 = vmatpush.bf16.msrb.mxu1 %v1010_v46 }
  0x2c   :  { %639 = vmatpush.bf16.msra.mxu2 %v1020_v10 }
  0x2d   :  { %586 = vmatpush.bf16.msrb.mxu3 %v1015_v1 }
  0x2e   :  { %502 = vmatpush.bf16.msrb.mxu0 %v1001_v47  ;;  %v1029_v47 = vld [vmem:[%s1314_s8] ss:$0 sm:$0xff] }
  0x2f   :  { %515 = vmatpush.bf16.msrb.mxu1 %v1009_v48 }
  0x30   :  { %640 = vmatpush.bf16.msra.mxu2 %v1019_v12 }
  0x31   :  { %587 = vmatpush.bf16.msrb.mxu3 %v1014_v4 }
  0x32   :  { %503 = vmatpush.bf16.msrb.mxu0 %v1000_v49 }
  0x33   :  { %516 = vmatpush.bf16.msrb.mxu1 %v1008_v50  ;;  %913 = vmatmul.msk.bf16.vlgmr.msrb.gmra.mxu2 %vm443_vm0, %v46_v54 }
  0x34   :  { %641 = vmatpush.bf16.msra.mxu2 %v1018_v30 }
  0x35   :  { %692 = vmatpush.bf16.msra.mxu3 %v1025_v31 }
  0x36   :  { %504 = vmatpush.bf16.msrb.mxu0 %v999_v52 }
  0x37   :  { %517 = vmatpush.bf16.msrb.mxu1 %v1007_v53 }
  0x39   :  { %693 = vmatpush.bf16.msra.mxu3 %v1024_v32 }
  0x3a   :  { %505 = vmatpush.bf16.msrb.mxu0 %v998_v55 }
  0x3b   :  { %518 = vmatpush.bf16.msrb.mxu1 %v1006_v56 }
  0x3d   :  { %694 = vmatpush.bf16.msra.mxu3 %v1023_v33 }
  0x3e   :  { %506 = vmatpush.bf16.msrb.mxu0 %v997_v57 }
  0x3f   :  { %519 = vmatpush.bf16.msrb.mxu1 %v1005_v58 }
  0x41   :  { %507 = vmatmul.bf16.vlgmr.msrb.gmra.mxu0 %v44_v61  ;;  %695 = vmatpush.bf16.msra.mxu3 %v1022_v40 }
  0x42   :  { %520 = vmatmul.bf16.vlgmr.msrb.gmra.mxu1 %v45_v62 }
  0x9e   :  { %v456_v2 = vpop.f32.mrf.mxu0 }
  0x9f   :  { %v469_v3 = vpop.f32.mrf.mxu1  ;;  %v457_v13 = vadd.f32 %v1026_v11, %v456_v2 }
  0xa1   :  { %v470_v16 = vadd.f32 %v469_v3, %v457_v13 }
  0xa6   :  { %v458_v5 = vpop.f32.mrf.mxu0  ;;  %v482_v8 = vpop.f32.mrf.mxu2 }
  0xa7   :  { %v471_v6 = vpop.f32.mrf.mxu1  ;;  %v495_v9 = vpop.f32.mrf.mxu3  ;;  %v483_v17 = vadd.f32 %v482_v8, %v470_v16 }
  0xa9   :  { %v496_v19 = vadd.f32 %v495_v9, %v483_v17 }
  0xae   :  { %v484_v14 = vpop.f32.mrf.mxu2 }
  0xaf   :  { %v497_v15 = vpop.f32.mrf.mxu3 }
  0xb6   :  { %v534_v18 = vpop.f32.mrf.mxu2 }
  0xbe   :  { %v508_v20 = vpop.f32.mrf.mxu0  ;;  %v536_v24 = vpop.f32.mrf.mxu2 }
  0xbf   :  { %v521_v21 = vpop.f32.mrf.mxu1  ;;  %v509_v22 = vadd.f32 %v508_v20, %v496_v19 }
  0xc1   :  { %v522_v23 = vadd.f32 %v521_v21, %v509_v22 }
  0xc3   :  { %v535_v25 = vadd.f32 %v534_v18, %v522_v23 }
  0xc5   :  { %v538_v26 = vmax.f32 %v535_v25, 0.0 }
  0xc6   :  { %v510_v27 = vpop.f32.mrf.mxu0 }
  0xc7   :  { %v523_v28 = vpop.f32.mrf.mxu1  ;;  %v539_v29 = vpack.c.bf16 %v538_v26, %v538_v26 }
  0xc9   :  { %930 = vmatmul.msk.bf16.vlgmr.msrb.gmra.mxu3 %vm576_vm1, %v539_v29 }
 0x14c   :  { %v589_v35 = vpop.f32.mrf.mxu3 }
 0x14d   :  { %v590_v36 = vadd.f32 %v1027_v34, %v589_v35 }
 0x14f   :  { %v593_v37 = vmax.f32 %v590_v36, 0.0 }
 0x151   :  { %v594_v38 = vpack.c.bf16 %v593_v37, %v593_v37 }
 0x153   :  { %947 = vmatmul.msk.bf16.vlgmr.msra.gmra.mxu2 %vm576_vm1, %v594_v38 }
 0x154   :  { %v591_v39 = vpop.f32.mrf.mxu3 }
 0x1d6   :  { %v643_v42 = vpop.f32.mrf.mxu2 }
 0x1d7   :  { %v644_v43 = vadd.f32 %v1028_v41, %v643_v42 }
 0x1d9   :  { %v647_v44 = vmax.f32 %v644_v43, 0.0 }
 0x1db   :  { %v648_v45 = vpack.c.bf16 %v647_v44, %v647_v44 }
 0x1dd   :  { %964 = vmatmul.msk.bf16.vlgmr.msra.gmra.mxu3 %vm576_vm1, %v648_v45 }
 0x1de   :  { %v645_v46 = vpop.f32.mrf.mxu2 }
 0x260   :  { %v697_v48 = vpop.f32.mrf.mxu3 }
 0x261   :  { %v698_v49 = vadd.f32 %v1029_v47, %v697_v48 }
 0x263   :  { %701 = vmax.xlane.f32.xlu0 %v698_v49 }
 0x268   :  { %v699_v50 = vpop.f32.mrf.mxu3 }
 0x2d6   :  { %v702_v51 = vpop.xlane.xlu0 %701 }
 0x2d7   :  { %v703_v52 = vsub.f32 %v698_v49, %v702_v51 }
 0x2d9   :  { %v704_v53 = vmul.f32 1.442695, %v703_v52 }
 0x2db   :  { %1030 = vpow2.f32 %v704_v53 }
 0x2e1   :  { %v1031_v54 = vpop.eup %1030 }
 0x2e2   :  { %706 = vadd.xlane.f32.xlu0 %v1031_v54 }
 0x355   :  { %v707_v55 = vpop.xlane.xlu0 %706 }
 0x356   :  { %1032 = vlog2.f32 %v707_v55 }
 0x35c   :  { %v1033_v56 = vpop.eup %1032 }
 0x35d   :  { %v709_v57 = vmul.f32 0.6931472, %v1033_v56 }
 0x35f   :  { %v710_v58 = vsub.f32 %v703_v52, %v709_v57 }
 0x361   :  { %v711_v59 = vpack.c.bf16 %v710_v58, %v710_v58 }
 0x363   :  { %712 = vst [vmem:[%s1315_s9] sm:$0xf] %v711_v59 }

</bundles_post_ra>
